<compile_context>
chip_gen: v7x
topology: tpu7x:2x2x1
jax: 0.10.0
libtpu: 0.0.40
codegen_flags: <defaults>
</compile_context>

<pallas_src>
import math

import jax
import jax.numpy as jnp
from jax import lax
from jax.experimental import pallas as pl
from jax.experimental.pallas import tpu as pltpu

_EPS = 1e-8


def _forgetting_sim_kernel(z_ref, za_ref, out_ref):
    """One row block: out[0,0] = sum_r cos(z[r], z_avg_extra[batch of row r])."""
    z = z_ref[...]                                    # [Tr, D] native dtype
    za = za_ref[...]                                  # [Tr, D] pre-scaled z_avg_extra rows
    d = z_ref.shape[1]
    ones = jnp.ones((d, 1), dtype=z.dtype)            # MXU reduce vector

    # Lane reductions on the MXU (f32 accumulation); the VPU only does 2 muls/elem.
    dot = jnp.dot(z * za, ones, preferred_element_type=jnp.float32)   # [Tr, 1]
    n1 = jnp.dot(z * z, ones, preferred_element_type=jnp.float32)     # [Tr, 1]

    inv_norm = lax.rsqrt(jnp.maximum(n1, jnp.float32(_EPS * _EPS)))    # EUP rsqrt
    cos = dot * inv_norm                                               # [Tr, 1]
    out_ref[...] = jnp.sum(cos, axis=0, keepdims=True)                 # (1, 1)


def _as_stacked(x):
    if isinstance(x, (list, tuple)):
        return jnp.stack(list(x), axis=0)
    return x


def _round_up(x, m):
    return ((x + m - 1) // m) * m


def _vmem_budget():
    """(target tile bytes, vmem_limit_bytes), re-derived per chip generation."""
    try:
        cap = int(pltpu.get_tpu_info().vmem_capacity_bytes)
    except Exception:
        cap = 64 * 1024 * 1024                       # be v7x-conservative
    if cap >= 96 * 1024 * 1024:                      # v5e / v6e (128 MiB VMEM)
        return 8 * 1024 * 1024, 48 * 1024 * 1024
    return 4 * 1024 * 1024, 40 * 1024 * 1024         # v7x (64 MiB VMEM)


def _call_kernel(z_flat, za_rows, *, tr, d, nblocks, za_index_map, vmem_limit,
                 cost, single_buffer_za):
    za_kwargs = {}
    if single_buffer_za:
        # Resident (constant / cycling index) input: no need to double-buffer it.
        za_kwargs = dict(pipeline_mode=pl.Buffered(1))
    return pl.pallas_call(
        _forgetting_sim_kernel,
        out_shape=jax.ShapeDtypeStruct((nblocks, 1), jnp.float32),
        grid=(nblocks,),
        in_specs=[
            pl.BlockSpec((tr, d), lambda j: (j, 0)),            # streamed z rows
            pl.BlockSpec((tr, d), za_index_map, **za_kwargs),   # resident za rows
        ],
        out_specs=pl.BlockSpec((1, 1), lambda j: (j, 0)),
        compiler_params=pltpu.CompilerParams(
            dimension_semantics=("parallel",),    # shard row blocks across TCs
            vmem_limit_bytes=vmem_limit,
        ),
        cost_estimate=cost,
    )(z_flat, za_rows)


def forgetting_similarity_loss(z_list, z_avg, z_list_extra, z_avg_extra):
    """Matches Forgetting_Similarity_Loss.forward; returns (-z_sim, z_sim)."""
    del z_avg, z_avg_extra        # recomputed internally, exactly like the module

    z = _as_stacked(z_list)             # [P, B, D] native dtype
    zx = _as_stacked(z_list_extra)      # [P, B, D]
    P, B, D = z.shape

    # z_avg_extra (f32 accumulation), pre-scaled by 1/max(||.||, eps) per row so
    # the kernel's per-row work is  (z . za_scaled) * rsqrt(max(||z||^2, eps^2)).
    z_avg_x = jnp.mean(zx, axis=0, dtype=jnp.float32)                  # [B, D]
    n2 = jnp.sum(z_avg_x * z_avg_x, axis=-1, keepdims=True)            # [B, 1]
    za_scaled = (z_avg_x * lax.rsqrt(jnp.maximum(n2, _EPS * _EPS))).astype(z.dtype)

    itemsize = jnp.dtype(z.dtype).itemsize
    target_bytes, vmem_limit = _vmem_budget()

    # ---- Row tiling: dense [rows, D] layout, blocks of whole patches. --------
    # step = smallest patch count whose row total is sublane-aligned (mult of 8).
    step = 8 // math.gcd(B, 8)
    patch_bytes = B * D * itemsize

    if step * patch_bytes <= target_bytes:
        # Common case: whole patches per block; za tile identical for every block.
        tp = max(step, (target_bytes // patch_bytes) // step * step)   # patches/block
        tp = min(tp, _round_up(P, step))
        p_pad = _round_up(P, tp)
        if p_pad != P:                       # zero patches contribute exactly 0
            z = jnp.pad(z, ((0, p_pad - P), (0, 0), (0, 0)))
        z_flat = z.reshape(p_pad * B, D)
        tr = tp * B
        za_rows = jnp.tile(za_scaled, (tp, 1))          # [tr, D], reused by all blocks
        za_index_map = lambda j: (0, 0)
        nblocks = (p_pad * B) // tr
    else:
        # Huge patches (B*D per patch exceeds the tile budget): tile rows inside
        # a patch; pad B so blocks never straddle a patch boundary.
        tr = max(8, (target_bytes // max(D * itemsize, 1)) // 8 * 8)
        b_pad = _round_up(B, tr)
        if b_pad != B:                       # zero rows contribute exactly 0
            z = jnp.pad(z, ((0, 0), (0, b_pad - B), (0, 0)))
            za_scaled = jnp.pad(za_scaled, ((0, b_pad - B), (0, 0)))
        z_flat = z.reshape(P * b_pad, D)
        za_rows = za_scaled                              # [b_pad, D]
        nb = b_pad // tr
        za_index_map = lambda j: (j % nb, 0)
        nblocks = (P * b_pad) // tr
    # TODO(synk): add a D-axis grid (partial-dot accumulation) for the pathological
    # huge-D / tiny-B case where even a single 8-row block of width D overflows VMEM.

    rows = z_flat.shape[0]
    cost = pl.CostEstimate(
        flops=6 * rows * D,                  # 2 VPU muls + 2 MXU MACs per element
        transcendentals=rows,                # one rsqrt per row
        bytes_accessed=(z_flat.size + za_rows.size) * itemsize + nblocks * 4,
    )

    try:
        partials = jax.block_until_ready(
            _call_kernel(z_flat, za_rows, tr=tr, d=D, nblocks=nblocks,
                         za_index_map=za_index_map, vmem_limit=vmem_limit,
                         cost=cost, single_buffer_za=True))
    except Exception:
        # Some JAX versions reject single-buffered pipeline_mode; the
        # double-buffered za tile still fits the VMEM budget.
        partials = _call_kernel(z_flat, za_rows, tr=tr, d=D, nblocks=nblocks,
                                za_index_map=za_index_map, vmem_limit=vmem_limit,
                                cost=cost, single_buffer_za=False)

    z_sim = jnp.sum(partials) / jnp.float32(P * B)
    return -z_sim, lax.stop_gradient(z_sim)


def _reference(z_list, z_list_extra):
    z = jnp.stack(list(z_list), axis=0).astype(jnp.float32)
    zx = jnp.stack(list(z_list_extra), axis=0).astype(jnp.float32)
    za = jnp.mean(zx, axis=0)
    dot = jnp.sum(z * za[None], axis=-1)
    n1 = jnp.sqrt(jnp.sum(z * z, axis=-1))
    n2 = jnp.sqrt(jnp.sum(za * za, axis=-1))
    cos = dot / (jnp.maximum(n1, _EPS) * jnp.maximum(n2, _EPS)[None])
    z_sim = jnp.mean(cos)
    return -z_sim, z_sim


if __name__ == "__main__":
    key = jax.random.PRNGKey(0)
    num_patch, batch, dim = 8, 4, 32

    k1, k2 = jax.random.split(key)
    z_stack = jax.random.normal(k1, (num_patch, batch, dim), dtype=jnp.float32)
    zx_stack = jax.random.normal(k2, (num_patch, batch, dim), dtype=jnp.float32)

    z_list = [z_stack[i] for i in range(num_patch)]
    z_list_extra = [zx_stack[i] for i in range(num_patch)]
    # The module accepts precomputed averages but recomputes them; pass dummies.
    z_avg = jnp.mean(z_stack, axis=0)
    z_avg_extra = jnp.mean(zx_stack, axis=0)

    neg_sim, sim_out = forgetting_similarity_loss(
        z_list, z_avg, z_list_extra, z_avg_extra
    )
    jax.block_until_ready((neg_sim, sim_out))

    ref_neg, ref_sim = _reference(z_list, z_list_extra)
    assert jnp.allclose(neg_sim, ref_neg, atol=1e-5, rtol=1e-5), (neg_sim, ref_neg)
    assert jnp.allclose(sim_out, ref_sim, atol=1e-5, rtol=1e-5), (sim_out, ref_sim)
    assert jnp.allclose(neg_sim, -sim_out)

    print("KERNEL_OK")
</pallas_src>

<mosaic_0001>
module attributes {stable_mosaic.version = 11 : i64} {
  func.func @_forgetting_sim_kernel(%arg0: i32, %arg1: memref<32x32xf32, #tpu.memory_space<vmem>>, %arg2: memref<32x32xf32, #tpu.memory_space<vmem>>, %arg3: memref<1x1xf32, #tpu.memory_space<vmem>>) attributes {dimension_semantics = [#tpu.dimension_semantics<parallel>], iteration_bounds = array<i64: 1>, scalar_prefetch = 0 : i64, scratch_operands = 0 : i64, tpu.core_type = #tpu.core_type<tc>, window_params = [{transform_indices = @transform_0, window_bounds = array<i64: 32, 32>}, {pipeline_mode = #tpu.pipeline_mode<synchronous>, transform_indices = @transform_1, window_bounds = array<i64: 32, 32>}, {transform_indices = @transform_2, window_bounds = array<i64: 1, 1>}]} {
    %c0 = arith.constant 0 : index
    %c0_0 = arith.constant 0 : index
    %0 = vector.load %arg1[%c0, %c0_0] : memref<32x32xf32, #tpu.memory_space<vmem>>, vector<32x32xf32>
    %c0_1 = arith.constant 0 : index
    %c0_2 = arith.constant 0 : index
    %1 = vector.load %arg2[%c0_1, %c0_2] : memref<32x32xf32, #tpu.memory_space<vmem>>, vector<32x32xf32>
    %cst = arith.constant 1.000000e+00 : f32
    %2 = vector.broadcast %cst : f32 to vector<32x1xf32>
    %3 = arith.mulf %0, %1 : vector<32x32xf32>
    %cst_3 = arith.constant dense<0.000000e+00> : vector<32x1xf32>
    %4 = tpu.matmul %3, %2, %cst_3 {dimension_numbers = #tpu.dot_dimension_numbers<[1], [0], [0], [1], [0, 0, 1, 1], [], []>} : vector<32x32xf32>, vector<32x1xf32>, vector<32x1xf32> -> vector<32x1xf32>
    %5 = arith.mulf %0, %0 : vector<32x32xf32>
    %cst_4 = arith.constant dense<0.000000e+00> : vector<32x1xf32>
    %6 = tpu.matmul %5, %2, %cst_4 {dimension_numbers = #tpu.dot_dimension_numbers<[1], [0], [0], [1], [0, 0, 1, 1], [], []>} : vector<32x32xf32>, vector<32x1xf32>, vector<32x1xf32> -> vector<32x1xf32>
    %cst_5 = arith.constant 1.000000e-16 : f32
    %7 = vector.broadcast %cst_5 : f32 to vector<32x1xf32>
    %8 = arith.maximumf %6, %7 : vector<32x1xf32>
    %9 = math.rsqrt %8 : vector<32x1xf32>
    %10 = arith.mulf %4, %9 : vector<32x1xf32>
    %cst_6 = arith.constant dense<0.000000e+00> : vector<1xf32>
    %11 = vector.multi_reduction <add>, %10, %cst_6 [0] : vector<32x1xf32> to vector<1xf32>
    %12 = vector.shape_cast %11 : vector<1xf32> to vector<1x1xf32>
    %c0_7 = arith.constant 0 : index
    %c0_8 = arith.constant 0 : index
    %13 = vector.load %arg3[%c0_7, %c0_8] : memref<1x1xf32, #tpu.memory_space<vmem>>, vector<1x1xf32>
    tpu.vector_store %arg3[%c0_7, %c0_8], %12 {strides = array<i32>} : memref<1x1xf32, #tpu.memory_space<vmem>>, vector<1x1xf32>,
    return
  }
  func.func @transform_0(%arg0: i32) -> (i32, i32) {
    %c0_i32 = arith.constant 0 : i32
    %c0_i32_0 = arith.constant 0 : i32
    return %arg0, %c0_i32 : i32, i32
  }
  func.func @transform_1(%arg0: i32) -> (i32, i32) {
    %c0_i32 = arith.constant 0 : i32
    %c0_i32_0 = arith.constant 0 : i32
    %c0_i32_1 = arith.constant 0 : i32
    return %c0_i32, %c0_i32_0 : i32, i32
  }
  func.func @transform_2(%arg0: i32) -> (i32, i32) {
    %c0_i32 = arith.constant 0 : i32
    %c0_i32_0 = arith.constant 0 : i32
    return %arg0, %c0_i32 : i32, i32
  }
}

module attributes {stable_mosaic.version = 11 : i64} {
  func.func @_forgetting_sim_kernel(%arg0: i32, %arg1: memref<32x32xf32, #tpu.memory_space<vmem>>, %arg2: memref<32x32xf32, #tpu.memory_space<vmem>>, %arg3: memref<1x1xf32, #tpu.memory_space<vmem>>) attributes {dimension_semantics = [#tpu.dimension_semantics<parallel>], iteration_bounds = array<i64: 1>, scalar_prefetch = 0 : i64, scratch_operands = 0 : i64, tpu.core_type = #tpu.core_type<tc>, window_params = [{transform_indices = @transform_0, window_bounds = array<i64: 32, 32>}, {pipeline_mode = #tpu.pipeline_mode<synchronous>, transform_indices = @transform_1, window_bounds = array<i64: 32, 32>}, {transform_indices = @transform_2, window_bounds = array<i64: 1, 1>}]} {
    %c0 = arith.constant 0 : index
    %c0_0 = arith.constant 0 : index
    %0 = vector.load %arg1[%c0, %c0_0] : memref<32x32xf32, #tpu.memory_space<vmem>>, vector<32x32xf32>
    %c0_1 = arith.constant 0 : index
    %c0_2 = arith.constant 0 : index
    %1 = vector.load %arg2[%c0_1, %c0_2] : memref<32x32xf32, #tpu.memory_space<vmem>>, vector<32x32xf32>
    %cst = arith.constant 1.000000e+00 : f32
    %2 = vector.broadcast %cst : f32 to vector<32x1xf32>
    %3 = arith.mulf %0, %1 : vector<32x32xf32>
    %cst_3 = arith.constant dense<0.000000e+00> : vector<32x1xf32>
    %4 = tpu.matmul %3, %2, %cst_3 {dimension_numbers = #tpu.dot_dimension_numbers<[1], [0], [0], [1], [0, 0, 1, 1], [], []>} : vector<32x32xf32>, vector<32x1xf32>, vector<32x1xf32> -> vector<32x1xf32>
    %5 = arith.mulf %0, %0 : vector<32x32xf32>
    %cst_4 = arith.constant dense<0.000000e+00> : vector<32x1xf32>
    %6 = tpu.matmul %5, %2, %cst_4 {dimension_numbers = #tpu.dot_dimension_numbers<[1], [0], [0], [1], [0, 0, 1, 1], [], []>} : vector<32x32xf32>, vector<32x1xf32>, vector<32x1xf32> -> vector<32x1xf32>
    %cst_5 = arith.constant 1.000000e-16 : f32
    %7 = vector.broadcast %cst_5 : f32 to vector<32x1xf32>
    %8 = arith.maximumf %6, %7 : vector<32x1xf32>
    %9 = math.rsqrt %8 : vector<32x1xf32>
    %10 = arith.mulf %4, %9 : vector<32x1xf32>
    %cst_6 = arith.constant dense<0.000000e+00> : vector<1xf32>
    %11 = vector.multi_reduction <add>, %10, %cst_6 [0] : vector<32x1xf32> to vector<1xf32>
    %12 = vector.shape_cast %11 : vector<1xf32> to vector<1x1xf32>
    %c0_7 = arith.constant 0 : index
    %c0_8 = arith.constant 0 : index
    %13 = vector.load %arg3[%c0_7, %c0_8] : memref<1x1xf32, #tpu.memory_space<vmem>>, vector<1x1xf32>
    tpu.vector_store %arg3[%c0_7, %c0_8], %12 {strides = array<i32>} : memref<1x1xf32, #tpu.memory_space<vmem>>, vector<1x1xf32>,
    return
  }
  func.func @transform_0(%arg0: i32) -> (i32, i32) {
    %c0_i32 = arith.constant 0 : i32
    %c0_i32_0 = arith.constant 0 : i32
    return %arg0, %c0_i32 : i32, i32
  }
  func.func @transform_1(%arg0: i32) -> (i32, i32) {
    %c0_i32 = arith.constant 0 : i32
    %c0_i32_0 = arith.constant 0 : i32
    %c0_i32_1 = arith.constant 0 : i32
    return %c0_i32, %c0_i32_0 : i32, i32
  }
  func.func @transform_2(%arg0: i32) -> (i32, i32) {
    %c0_i32 = arith.constant 0 : i32
    %c0_i32_0 = arith.constant 0 : i32
    return %arg0, %c0_i32 : i32, i32
  }
}

</mosaic_0001>

<bundles_post_ra>
// kernel: tpu_custom_call.1
= control target key start
LH: loop header
LB: loop body
LE: loop exit
PB: predicated region body
PF: predicated region fallthrough
CT: control target
= control target key end

     0   :  { %7 = vsyncpa [#allocation3], 0  ;;  %s506_s0 = inlined_call_operand.hbm [shape: f32[32,32], index: 0, kind: input, shape index: {}]   ;;  %s507_s1 = inlined_call_operand.hbm [shape: f32[32,32], index: 1, kind: input, shape index: {}]   ;;  %s508_s2 = inlined_call_operand.hbm [shape: f32[1,1], index: 2, kind: output, shape index: {}]  }
   0x1   :  { %8 = vsyncpa [#allocation6], 0 }
   0x2   :  { %9 = vsyncpa [#allocation4], 0  ;;  %s441_s9 = smov [#allocation2]   ;;  %s369_s13 = scalar_lea.hbm %s506_s0, 512 }
   0x3   :  { %s15_s10 = sshll.u32 %s441_s9, 4  ;;  %p370_p0 = scmp.ne.s32.totalorder %s506_s0, %s369_s13  ;;  %s16_s10 = int_to_ptr.vmem [resolvable:$true] %s15_s10 }
   0x4   :  { %p373_p1 = scmp.lt.u32.totalorder %s369_s13, %s506_s0 }
   0x6   :  { %p375_p2 = pnand %p373_p1, %p370_p0 }
   0x8   :  { %378 = shalt.err (!%p375_p2)
}
   0x9   :  { %s379_s18 = scalar_lea.vmem %s16_s10, 512  ;;  %p384_p4 = scmp.lt.s32.totalorder %s16_s10, %s16_s10 }
   0xa   :  { %p380_p3 = scmp.ne.s32.totalorder %s16_s10, %s379_s18  ;;  %p385_p5 = scmp.lt.s32.totalorder %s379_s18, %s379_s18 }
   0xc   :  { %p386_p6 = por %p385_p5, %p384_p4 }
   0xe   :  { %p387_p7 = pnand %p386_p6, %p380_p3 }
  0x10   :  { %390 = shalt.err (!%p387_p7)
}
  0x11   :  { %s442_s19 = smov 128   ;;  %s443_s20 = smov 8  }
  0x12   :  { %21 = dma.hbm_to_vmem [thread:$0]  %s506_s0, 512, %s16_s10, [#allocation3], %s442_s19, %s442_s19, %s443_s20  }
  0x13   :  { %s444_s23 = smov [#allocation5]   ;;  %s391_s27 = scalar_lea.hbm %s507_s1, 512 }
  0x14   :  { %s27_s24 = sshll.u32 %s444_s23, 4  ;;  %p392_p8 = scmp.ne.s32.totalorder %s507_s1, %s391_s27  ;;  %s28_s24 = int_to_ptr.vmem [resolvable:$true] %s27_s24 }
  0x15   :  { %p395_p9 = scmp.lt.u32.totalorder %s391_s27, %s507_s1 }
  0x17   :  { %p397_p10 = pnand %p395_p9, %p392_p8 }
  0x19   :  { %400 = shalt.err (!%p397_p10)
}
  0x1a   :  { %s401_s4 = scalar_lea.vmem %s28_s24, 512  ;;  %p406_p12 = scmp.lt.s32.totalorder %s28_s24, %s28_s24 }
  0x1b   :  { %p402_p11 = scmp.ne.s32.totalorder %s28_s24, %s401_s4  ;;  %p407_p13 = scmp.lt.s32.totalorder %s401_s4, %s401_s4 }
  0x1d   :  { %p408_p0 = por %p407_p13, %p406_p12 }
  0x1f   :  { %p409_p1 = pnand %p408_p0, %p402_p11 }
  0x21   :  { %412 = shalt.err (!%p409_p1)
}
  0x22   :  { %33 = dma.hbm_to_vmem [thread:$0]  %s507_s1, 512, %s28_s24, [#allocation6], %s442_s19, %s442_s19, %s443_s20  }
  0x23   :  { %435 = dma.done.wait [#allocation3], 512  }
  0x24   :  { %436 = vsyncadd [#allocation3], 4294966784 }
  0x25   :  { %437 = dma.done.wait [#allocation6], 512  }
  0x26   :  { %438 = vsyncadd [#allocation6], 4294966784  ;;  %v445_v0 = vmov 1.0|1.0   ;;  %v40_v1 = vld [vmem:[#allocation2] sm:$0xff]  ;;  %vm52_vm0 = vcmask 261120  }
  0x27   :  { %351 = vmatprep.subr.bf16.mxu1 %v445_v0  ;;  %347 = vmatprep.subr.bf16.mxu0 %v445_v0  ;;  %v41_v2 = vld [vmem:[#allocation2 + $0x8] sm:$0xff]  ;;  %v42_v3 = vld [vmem:[#allocation2 + $0x10] sm:$0xff]  ;;  %v150_v4 = vmul.f32 %v40_v1, %v40_v1  ;;  %v43_v7 = vld [vmem:[#allocation2 + $0x18] sm:$0xff]  ;;  %vm263_vm1 = vcmask 7168   ;;  %s446_s1 = smov [#allocation7]   ;;  %vm277_vm2 = vcmask 0  }
  0x28   :  { %352 = vmatpush3.bf16.msra.mxu1 %v445_v0  ;;  %348 = vmatpush3.bf16.msra.mxu0 %v445_v0  ;;  %v151_v5 = vmul.f32 %v41_v2, %v41_v2  ;;  %v152_v6 = vmul.f32 %v42_v3, %v42_v3  ;;  %v44_v8 = vld [vmem:[#allocation5] sm:$0xff]  ;;  %v45_v9 = vld [vmem:[#allocation5 + $0x8] sm:$0xff]  ;;  %v46_v12 = vld [vmem:[#allocation5 + $0x10] sm:$0xff]  ;;  %v153_v15 = vmul.f32 %v43_v7, %v43_v7  ;;  %s285_s6 = sshll.u32 %s446_s1, 4  ;;  %s286_s6 = int_to_ptr.vmem [resolvable:$true] %s285_s6 }
  0x29   :  { %353 = vmatprep.subr.bf16.mxu1 %v445_v0  ;;  %349 = vmatprep.subr.bf16.mxu0 %v445_v0  ;;  %v48_v10 = vmul.f32 %v44_v8, %v40_v1  ;;  %v49_v11 = vmul.f32 %v45_v9, %v41_v2  ;;  %v47_v13 = vld [vmem:[#allocation5 + $0x18] sm:$0xff]  ;;  %v50_v14 = vmul.f32 %v46_v12, %v42_v3  ;;  %s413_s7 = scalar_lea.vmem %s286_s6, 16  ;;  %s417_s8 = scalar_lea.vmem %s286_s6, 32 }
  0x2a   :  { %341 = vmatprep.mubr.msk.f32.mxu1 %vm52_vm0, %v150_v4  ;;  %v51_v16 = vmul.f32 %v47_v13, %v43_v7  ;;  %p414_p2 = scmp.ne.s32.totalorder %s286_s6, %s413_s7  ;;  %p418_p3 = scmp.lt.s32.totalorder %s286_s6, %s286_s6 }
  0x2b   :  { %327 = vmatprep.mubr.msk.f32.mxu0 %vm52_vm0, %v48_v10  ;;  %p419_p4 = scmp.lt.s32.totalorder %s417_s8, %s413_s7 }
  0x2c   :  { %354 = vmatpush3.bf16.msra.mxu1 %v445_v0  ;;  %350 = vmatpush3.bf16.msra.mxu0 %v445_v0 }
  0x2d   :  { %p420_p5 = por %p419_p4, %p418_p3 }
  0x2f   :  { %342 = vmatmul.mubr.msk.f32.vlgmr.msra.gmra.mrb[0].mxu1 %vm52_vm0, %v151_v5  ;;  %328 = vmatmul.mubr.msk.f32.vlgmr.msra.gmra.mrb[0].mxu0 %vm52_vm0, %v49_v11  ;;  %p421_p6 = pnand %p420_p5, %p414_p2 }
  0x30   :  { %344 = vmatprep.mubr.msk.f32.mxu1 %vm52_vm0, %v152_v6  ;;  %330 = vmatprep.mubr.msk.f32.mxu0 %vm52_vm0, %v50_v14 }
  0x33   :  { %345 = vmatmul.mubr.msk.f32.gmra.mrb[2].mxu1 %vm52_vm0, %v153_v15  ;;  %331 = vmatmul.mubr.msk.f32.gmra.mrb[2].mxu0 %vm52_vm0, %v51_v16 }
 0x102   :  { %v343_v17 = vpop.f32.mrb[0].mxu1  ;;  %v329_v20 = vpop.f32.mrb[0].mxu0 }
 0x103   :  { %v252_v18 = vmax.f32 %v343_v17, 1e-16  ;;  %v232_v19 = vpop.f32.mrb[1].mxu1  ;;  %v131_v22 = vpop.f32.mrb[1].mxu0 }
 0x104   :  { %v251_v21 = vmax.f32 %v232_v19, 1e-16 }
 0x105   :  { %361 = vrsqrt.f32 %v252_v18 }
 0x106   :  { %363 = vrsqrt.f32 %v251_v21  ;;  %v346_v23 = vpop.f32.mrb[2].mxu1  ;;  %v332_v26 = vpop.f32.mrb[2].mxu0 }
 0x107   :  { %v254_v24 = vmax.f32 %v346_v23, 1e-16  ;;  %v242_v25 = vpop.f32.mrb[3].mxu1  ;;  %v141_v28 = vpop.f32.mrb[3].mxu0 }
 0x108   :  { %v253_v27 = vmax.f32 %v242_v25, 1e-16 }
 0x109   :  { %365 = vrsqrt.f32 %v254_v24 }
 0x10a   :  { %367 = vrsqrt.f32 %v253_v27 }
 0x10f   :  { %v362_v29 = vpop.eup %361 }
 0x110   :  { %v364_v30 = vpop.eup %363  ;;  %v260_v31 = vmul.f32 %v362_v29, %v329_v20 }
 0x111   :  { %v259_v32 = vmul.f32 %v364_v30, %v131_v22 }
 0x112   :  { %v265_v33 = vsel %vm263_vm1, %v260_v31, 0.0 }
 0x113   :  { %v366_v34 = vpop.eup %365  ;;  %v264_v35 = vsel %vm263_vm1, %v259_v32, 0.0 }
 0x114   :  { %v368_v36 = vpop.eup %367  ;;  %v266_v37 = vadd.f32 %v265_v33, %v264_v35  ;;  %v262_v38 = vmul.f32 %v366_v34, %v332_v26 }
 0x115   :  { %v261_v39 = vmul.f32 %v368_v36, %v141_v28 }
 0x116   :  { %v269_v42 = vsel %vm263_vm1, %v262_v38, 0.0 }
 0x117   :  { %v267_v40 = vsel %vm263_vm1, %v261_v39, 0.0 }
 0x118   :  { %v268_v41 = vadd.f32 %v267_v40, %v266_v37 }
 0x11a   :  { %v270_v43 = vadd.f32 %v269_v42, %v268_v41 }
 0x11c   :  { %v271_v44 = vrot.slane %v270_v43, 4 }
 0x11e   :  { %v272_v45 = vadd.f32 %v271_v44, %v270_v43 }
 0x120   :  { %v273_v46 = vrot.slane %v272_v45, 2 }
 0x122   :  { %v274_v47 = vadd.f32 %v273_v46, %v272_v45 }
 0x124   :  { %v275_v48 = vrot.slane %v274_v47, 1 }
 0x126   :  { %v276_v49 = vadd.f32 %v275_v48, %v274_v47 }
 0x128   :  { %278 = vst.msk [vmem:[#allocation7] sm:$0x1] %vm277_vm2, %v276_v49 }
 0x129   :  { %424 = shalt.err (!%p421_p6)
}
 0x12a   :  { %s425_s11 = scalar_lea.hbm %s508_s2, 16 }
 0x12b   :  { %p426_p7 = scmp.ne.s32.totalorder %s508_s2, %s425_s11  ;;  %p429_p8 = scmp.lt.u32.totalorder %s425_s11, %s508_s2 }
 0x12d   :  { %p431_p9 = pnand %p429_p8, %p426_p7 }
 0x12f   :  { %434 = shalt.err (!%p431_p9)
}
 0x130   :  { %288 = dma.vmem_to_hbm [thread:$0]  %s286_s6, 16, %s508_s2, [#allocation4]  }
 0x131   :  { %439 = dma.done.wait [#allocation4], 16  }
 0x132   :  { %440 = vsyncadd [#allocation4], 4294967280 }
 0x133   :  { %292 = vsyncpa [#allocation3], 1 }
 0x134   :  { %293 = vsyncpa [#allocation6], 1 }
 0x135   :  { %294 = vsyncpa [#allocation4], 1 }

// kernel: tpu_custom_call.1
= control target key start
LH: loop header
LB: loop body
LE: loop exit
PB: predicated region body
PF: predicated region fallthrough
CT: control target
= control target key end

     0   :  { %7 = vsyncpa [#allocation3], 0  ;;  %s506_s0 = inlined_call_operand.hbm [shape: f32[32,32], index: 0, kind: input, shape index: {}]   ;;  %s507_s1 = inlined_call_operand.hbm [shape: f32[32,32], index: 1, kind: input, shape index: {}]   ;;  %s508_s2 = inlined_call_operand.hbm [shape: f32[1,1], index: 2, kind: output, shape index: {}]  }
   0x1   :  { %8 = vsyncpa [#allocation6], 0 }
   0x2   :  { %9 = vsyncpa [#allocation4], 0  ;;  %s441_s9 = smov [#allocation2]   ;;  %s369_s13 = scalar_lea.hbm %s506_s0, 512 }
   0x3   :  { %s15_s10 = sshll.u32 %s441_s9, 4  ;;  %p370_p0 = scmp.ne.s32.totalorder %s506_s0, %s369_s13  ;;  %s16_s10 = int_to_ptr.vmem [resolvable:$true] %s15_s10 }
   0x4   :  { %p373_p1 = scmp.lt.u32.totalorder %s369_s13, %s506_s0 }
   0x6   :  { %p375_p2 = pnand %p373_p1, %p370_p0 }
   0x8   :  { %378 = shalt.err (!%p375_p2)
}
   0x9   :  { %s379_s18 = scalar_lea.vmem %s16_s10, 512  ;;  %p384_p4 = scmp.lt.s32.totalorder %s16_s10, %s16_s10 }
   0xa   :  { %p380_p3 = scmp.ne.s32.totalorder %s16_s10, %s379_s18  ;;  %p385_p5 = scmp.lt.s32.totalorder %s379_s18, %s379_s18 }
   0xc   :  { %p386_p6 = por %p385_p5, %p384_p4 }
   0xe   :  { %p387_p7 = pnand %p386_p6, %p380_p3 }
  0x10   :  { %390 = shalt.err (!%p387_p7)
}
  0x11   :  { %s442_s19 = smov 128   ;;  %s443_s20 = smov 8  }
  0x12   :  { %21 = dma.hbm_to_vmem [thread:$0]  %s506_s0, 512, %s16_s10, [#allocation3], %s442_s19, %s442_s19, %s443_s20  }
  0x13   :  { %s444_s23 = smov [#allocation5]   ;;  %s391_s27 = scalar_lea.hbm %s507_s1, 512 }
  0x14   :  { %s27_s24 = sshll.u32 %s444_s23, 4  ;;  %p392_p8 = scmp.ne.s32.totalorder %s507_s1, %s391_s27  ;;  %s28_s24 = int_to_ptr.vmem [resolvable:$true] %s27_s24 }
  0x15   :  { %p395_p9 = scmp.lt.u32.totalorder %s391_s27, %s507_s1 }
  0x17   :  { %p397_p10 = pnand %p395_p9, %p392_p8 }
  0x19   :  { %400 = shalt.err (!%p397_p10)
}
  0x1a   :  { %s401_s4 = scalar_lea.vmem %s28_s24, 512  ;;  %p406_p12 = scmp.lt.s32.totalorder %s28_s24, %s28_s24 }
  0x1b   :  { %p402_p11 = scmp.ne.s32.totalorder %s28_s24, %s401_s4  ;;  %p407_p13 = scmp.lt.s32.totalorder %s401_s4, %s401_s4 }
  0x1d   :  { %p408_p0 = por %p407_p13, %p406_p12 }
  0x1f   :  { %p409_p1 = pnand %p408_p0, %p402_p11 }
  0x21   :  { %412 = shalt.err (!%p409_p1)
}
  0x22   :  { %33 = dma.hbm_to_vmem [thread:$0]  %s507_s1, 512, %s28_s24, [#allocation6], %s442_s19, %s442_s19, %s443_s20  }
  0x23   :  { %435 = dma.done.wait [#allocation3], 512  }
  0x24   :  { %436 = vsyncadd [#allocation3], 4294966784 }
  0x25   :  { %437 = dma.done.wait [#allocation6], 512  }
  0x26   :  { %438 = vsyncadd [#allocation6], 4294966784  ;;  %v445_v0 = vmov 1.0|1.0   ;;  %v40_v1 = vld [vmem:[#allocation2] sm:$0xff]  ;;  %vm52_vm0 = vcmask 261120  }
  0x27   :  { %351 = vmatprep.subr.bf16.mxu1 %v445_v0  ;;  %347 = vmatprep.subr.bf16.mxu0 %v445_v0  ;;  %v41_v2 = vld [vmem:[#allocation2 + $0x8] sm:$0xff]  ;;  %v42_v3 = vld [vmem:[#allocation2 + $0x10] sm:$0xff]  ;;  %v150_v4 = vmul.f32 %v40_v1, %v40_v1  ;;  %v43_v7 = vld [vmem:[#allocation2 + $0x18] sm:$0xff]  ;;  %vm263_vm1 = vcmask 7168   ;;  %s446_s1 = smov [#allocation7]   ;;  %vm277_vm2 = vcmask 0  }
  0x28   :  { %352 = vmatpush3.bf16.msra.mxu1 %v445_v0  ;;  %348 = vmatpush3.bf16.msra.mxu0 %v445_v0  ;;  %v151_v5 = vmul.f32 %v41_v2, %v41_v2  ;;  %v152_v6 = vmul.f32 %v42_v3, %v42_v3  ;;  %v44_v8 = vld [vmem:[#allocation5] sm:$0xff]  ;;  %v45_v9 = vld [vmem:[#allocation5 + $0x8] sm:$0xff]  ;;  %v46_v12 = vld [vmem:[#allocation5 + $0x10] sm:$0xff]  ;;  %v153_v15 = vmul.f32 %v43_v7, %v43_v7  ;;  %s285_s6 = sshll.u32 %s446_s1, 4  ;;  %s286_s6 = int_to_ptr.vmem [resolvable:$true] %s285_s6 }
  0x29   :  { %353 = vmatprep.subr.bf16.mxu1 %v445_v0  ;;  %349 = vmatprep.subr.bf16.mxu0 %v445_v0  ;;  %v48_v10 = vmul.f32 %v44_v8, %v40_v1  ;;  %v49_v11 = vmul.f32 %v45_v9, %v41_v2  ;;  %v47_v13 = vld [vmem:[#allocation5 + $0x18] sm:$0xff]  ;;  %v50_v14 = vmul.f32 %v46_v12, %v42_v3  ;;  %s413_s7 = scalar_lea.vmem %s286_s6, 16  ;;  %s417_s8 = scalar_lea.vmem %s286_s6, 32 }
  0x2a   :  { %341 = vmatprep.mubr.msk.f32.mxu1 %vm52_vm0, %v150_v4  ;;  %v51_v16 = vmul.f32 %v47_v13, %v43_v7  ;;  %p414_p2 = scmp.ne.s32.totalorder %s286_s6, %s413_s7  ;;  %p418_p3 = scmp.lt.s32.totalorder %s286_s6, %s286_s6 }
  0x2b   :  { %327 = vmatprep.mubr.msk.f32.mxu0 %vm52_vm0, %v48_v10  ;;  %p419_p4 = scmp.lt.s32.totalorder %s417_s8, %s413_s7 }
  0x2c   :  { %354 = vmatpush3.bf16.msra.mxu1 %v445_v0  ;;  %350 = vmatpush3.bf16.msra.mxu0 %v445_v0 }
  0x2d   :  { %p420_p5 = por %p419_p4, %p418_p3 }
  0x2f   :  { %342 = vmatmul.mubr.msk.f32.vlgmr.msra.gmra.mrb[0].mxu1 %vm52_vm0, %v151_v5  ;;  %328 = vmatmul.mubr.msk.f32.vlgmr.msra.gmra.mrb[0].mxu0 %vm52_vm0, %v49_v11  ;;  %p421_p6 = pnand %p420_p5, %p414_p2 }
  0x30   :  { %344 = vmatprep.mubr.msk.f32.mxu1 %vm52_vm0, %v152_v6  ;;  %330 = vmatprep.mubr.msk.f32.mxu0 %vm52_vm0, %v50_v14 }
  0x33   :  { %345 = vmatmul.mubr.msk.f32.gmra.mrb[2].mxu1 %vm52_vm0, %v153_v15  ;;  %331 = vmatmul.mubr.msk.f32.gmra.mrb[2].mxu0 %vm52_vm0, %v51_v16 }
 0x102   :  { %v343_v17 = vpop.f32.mrb[0].mxu1  ;;  %v329_v20 = vpop.f32.mrb[0].mxu0 }
 0x103   :  { %v252_v18 = vmax.f32 %v343_v17, 1e-16  ;;  %v232_v19 = vpop.f32.mrb[1].mxu1  ;;  %v131_v22 = vpop.f32.mrb[1].mxu0 }
 0x104   :  { %v251_v21 = vmax.f32 %v232_v19, 1e-16 }
 0x105   :  { %361 = vrsqrt.f32 %v252_v18 }
 0x106   :  { %363 = vrsqrt.f32 %v251_v21  ;;  %v346_v23 = vpop.f32.mrb[2].mxu1  ;;  %v332_v26 = vpop.f32.mrb[2].mxu0 }
 0x107   :  { %v254_v24 = vmax.f32 %v346_v23, 1e-16  ;;  %v242_v25 = vpop.f32.mrb[3].mxu1  ;;  %v141_v28 = vpop.f32.mrb[3].mxu0 }
 0x108   :  { %v253_v27 = vmax.f32 %v242_v25, 1e-16 }
 0x109   :  { %365 = vrsqrt.f32 %v254_v24 }
 0x10a   :  { %367 = vrsqrt.f32 %v253_v27 }
 0x10f   :  { %v362_v29 = vpop.eup %361 }
 0x110   :  { %v364_v30 = vpop.eup %363  ;;  %v260_v31 = vmul.f32 %v362_v29, %v329_v20 }
 0x111   :  { %v259_v32 = vmul.f32 %v364_v30, %v131_v22 }
 0x112   :  { %v265_v33 = vsel %vm263_vm1, %v260_v31, 0.0 }
 0x113   :  { %v366_v34 = vpop.eup %365  ;;  %v264_v35 = vsel %vm263_vm1, %v259_v32, 0.0 }
 0x114   :  { %v368_v36 = vpop.eup %367  ;;  %v266_v37 = vadd.f32 %v265_v33, %v264_v35  ;;  %v262_v38 = vmul.f32 %v366_v34, %v332_v26 }
 0x115   :  { %v261_v39 = vmul.f32 %v368_v36, %v141_v28 }
 0x116   :  { %v269_v42 = vsel %vm263_vm1, %v262_v38, 0.0 }
 0x117   :  { %v267_v40 = vsel %vm263_vm1, %v261_v39, 0.0 }
 0x118   :  { %v268_v41 = vadd.f32 %v267_v40, %v266_v37 }
 0x11a   :  { %v270_v43 = vadd.f32 %v269_v42, %v268_v41 }
 0x11c   :  { %v271_v44 = vrot.slane %v270_v43, 4 }
 0x11e   :  { %v272_v45 = vadd.f32 %v271_v44, %v270_v43 }
 0x120   :  { %v273_v46 = vrot.slane %v272_v45, 2 }
 0x122   :  { %v274_v47 = vadd.f32 %v273_v46, %v272_v45 }
 0x124   :  { %v275_v48 = vrot.slane %v274_v47, 1 }
 0x126   :  { %v276_v49 = vadd.f32 %v275_v48, %v274_v47 }
 0x128   :  { %278 = vst.msk [vmem:[#allocation7] sm:$0x1] %vm277_vm2, %v276_v49 }
 0x129   :  { %424 = shalt.err (!%p421_p6)
}
 0x12a   :  { %s425_s11 = scalar_lea.hbm %s508_s2, 16 }
 0x12b   :  { %p426_p7 = scmp.ne.s32.totalorder %s508_s2, %s425_s11  ;;  %p429_p8 = scmp.lt.u32.totalorder %s425_s11, %s508_s2 }
 0x12d   :  { %p431_p9 = pnand %p429_p8, %p426_p7 }
 0x12f   :  { %434 = shalt.err (!%p431_p9)
}
 0x130   :  { %288 = dma.vmem_to_hbm [thread:$0]  %s286_s6, 16, %s508_s2, [#allocation4]  }
 0x131   :  { %439 = dma.done.wait [#allocation4], 16  }
 0x132   :  { %440 = vsyncadd [#allocation4], 4294967280 }
 0x133   :  { %292 = vsyncpa [#allocation3], 1 }
 0x134   :  { %293 = vsyncpa [#allocation6], 1 }
 0x135   :  { %294 = vsyncpa [#allocation4], 1 }

</bundles_post_ra>
